<compile_context>
chip_gen: v7x
topology: tpu7x:2x2x1
jax: 0.10.0
libtpu: 0.0.40
codegen_flags: <defaults>
</compile_context>

<pallas_src>
import math
import numpy as np
import jax
import jax.numpy as jnp
from jax.experimental import pallas as pl
from jax.experimental.pallas import tpu as pltpu


# ----------------------------- adjacency setup (numpy, mirrors the PyTorch __init__) --
def k_adjacency(A, k, with_self=False, self_factor=1):
    I = np.eye(len(A), dtype=A.dtype)
    if k == 0:
        return I
    Ak = np.minimum(np.linalg.matrix_power(A + I, k), 1) \
       - np.minimum(np.linalg.matrix_power(A + I, k - 1), 1)
    if with_self:
        Ak = Ak + self_factor * I
    return Ak


def normalize_adjacency_matrix(A):
    node_degrees = A.sum(-1)
    degs_inv_sqrt = np.power(node_degrees, -0.5)
    norm_degs_matrix = np.diag(degs_inv_sqrt)
    return (norm_degs_matrix @ A @ norm_degs_matrix).astype(np.float32)


def build_A_powers(A_binary, num_scales):
    A_powers = [k_adjacency(A_binary, k, with_self=True) for k in range(num_scales)]
    A_powers = np.concatenate([normalize_adjacency_matrix(g) for g in A_powers])
    return A_powers.astype(np.float32)  # (num_scales*V, V)


# ----------------------------- tiling & budgets ----------------------------------------
def _pick_tiles(T, V):
    """Pick (tT, Vp): tT | T, Vp >= V, (tT*Vp) % 128 == 0, minimizing (tT*Vp, Vp).

    Small tiles minimize the Kronecker-expanded operator M (HBM/VMEM ~ S*(tT*Vp)^2) and
    its MXU flop inflation (~ tT), keep the output lane-dense, and maximize the number
    of grid steps available for megacore ('parallel') sharding on v7x."""
    best_key, best_tT, best_Vp = None, None, None
    for tT in range(1, T + 1):
        if T % tT:
            continue
        m = 128 // math.gcd(tT, 128)            # Vp must be a multiple of m
        Vp = ((V + m - 1) // m) * m
        key = (tT * Vp, Vp)
        if best_key is None or key < best_key:
            best_key, best_tT, best_Vp = key, tT, Vp
    return best_tT, best_Vp


def _vmem_budget_bytes():
    """Generation-aware scoped-VMEM cap (~48 MiB on v7x, ~96 MiB on v5e/v6e)."""
    cap = None
    try:
        cap = getattr(pltpu.get_tpu_info(), "vmem_capacity_bytes", None)
    except Exception:
        cap = None
    if not cap:
        cap = 64 << 20                          # conservative: v7x per-core VMEM
    return int(cap) * 3 // 4                    # leave headroom for the compiler


# ----------------------------- one-time constant preparation ---------------------------
def prepare_msgcn(params, num_scales, T, V, compute_dtype=jnp.bfloat16):
    """Hoisted out of the per-call path (review item: cache M / w / shift like PyTorch
    caches A_powers).  Folds BatchNorm(eval) + conv bias into the 1x1-conv weight and a
    single shift vector, and builds the per-tile block-diagonal graph operator
        M_cat[:, s*tTV:(s+1)*tTV] = I_tT (x) A_s^T,  A_s = (A_powers + A_res)[sV:(s+1)V],
    zero-padded to Vp vertices so the lane width is a multiple of 128."""
    S = num_scales
    A = params["A_powers"] + params["A_res"]                    # (S*V, V), pre-add once
    W, b = params["conv_w"], params["conv_b"]                   # (O, S*C), (O,)
    gamma, beta = params["bn_gamma"], params["bn_beta"]
    mean, var, eps = params["bn_mean"], params["bn_var"], params["bn_eps"]
    O = W.shape[0]
    C = W.shape[1] // S

    tT, Vp = _pick_tiles(T, V)
    tTV = tT * Vp

    # fold BN(eval) scale into the conv weight; bias + BN shift into one vector
    scale = gamma / jnp.sqrt(var + eps)                         # (O,)
    shift = ((b - mean) * scale + beta).reshape(O, 1).astype(jnp.float32)
    w_f = (W * scale[:, None]).astype(compute_dtype)            # (O, S*C)

    # block-diagonal graph operator for all scales, concatenated along lanes
    A3 = A.reshape(S, V, V)
    A3p = jnp.zeros((S, Vp, Vp), A.dtype).at[:, :V, :V].set(A3)
    eye = jnp.eye(tT, dtype=A.dtype)
    # M[s, t*Vp+u, q*Vp+v] = delta_{tq} * A_s[v, u]   (= I_tT (x) A_s^T)
    M = jnp.einsum("tq,svu->stuqv", eye, A3p).reshape(S, tTV, tTV)
    M_cat = M.transpose(1, 0, 2).reshape(tTV, S * tTV).astype(compute_dtype)

    return dict(M_cat=M_cat, w_f=w_f, shift=shift,
                num_scales=S, in_channels=C, out_channels=O,
                tT=tT, Vp=Vp, compute_dtype=compute_dtype)


# ----------------------------- fused Pallas kernel --------------------------------------
def _fused_msgcn_kernel(x_ref, m_ref, w_ref, shift_ref, o_ref, sup_ref):
    # x_ref:     (1, C, tTV)      one sample, one time block, lane-dense (NCHW-flattened)
    # m_ref:     (tTV, S*tTV)     all scales' I (x) A_s^T, concatenated along lanes
    # w_ref:     (O, S*C)         1x1-conv weight with BN scale folded in
    # shift_ref: (O, 1)           conv bias + BN shift (f32)
    # o_ref:     (1, O, tTV)      output block in NCHW-flattened layout
    # sup_ref:   (S*C, tTV)       VMEM scratch: scale-stacked graph aggregation
    tTV = o_ref.shape[2]
    num_scales = m_ref.shape[1] // tTV
    C = x_ref.shape[1]

    # Stage 1: graph aggregation for ALL scales in a single MXU matmul (K = tTV).
    sup_all = jnp.dot(x_ref[0], m_ref[...], preferred_element_type=jnp.float32)

    # Restack: lane-slice s -> sublane rows [s*C:(s+1)*C] so stage 2 contracts over S*C.
    for s in range(num_scales):                 # static unroll, S is small
        sup_ref[s * C:(s + 1) * C, :] = (
            sup_all[:, s * tTV:(s + 1) * tTV].astype(sup_ref.dtype))

    # Stage 2: 1x1 conv over all scales in one MXU matmul (K = S*C), fused BN + ReLU.
    y = jnp.dot(w_ref[...], sup_ref[...], preferred_element_type=jnp.float32)
    y = y + shift_ref[...]                      # (O,1) broadcasts over lanes, f32 epilogue
    o_ref[0] = jnp.maximum(y, 0.0).astype(o_ref.dtype)


# ----------------------------- forward wrapper -------------------------------------------
def multiscale_graph_conv_forward(x, consts):
    """x: (N, C, T, V) float32 (NCHW, like PyTorch). Returns (N, out_channels, T, V)."""
    N, C, T, V = x.shape
    S, O = consts["num_scales"], consts["out_channels"]
    tT, Vp, cd = consts["tT"], consts["Vp"], consts["compute_dtype"]
    tTV = tT * Vp
    assert C == consts["in_channels"] and T % tT == 0

    # lane-dense input: zero-pad V -> Vp (no-op at the test shape), flatten (T,V) lanes
    xp = x if Vp == V else jnp.pad(x, ((0, 0), (0, 0), (0, 0), (0, Vp - V)))
    x_flat = xp.reshape(N, C, T * Vp).astype(cd)

    esz = jnp.dtype(cd).itemsize
    need = (2 * (C * tTV + O * tTV) * esz                       # pipelined x / out blocks
            + (tTV * S * tTV + O * S * C + S * C * tTV) * esz   # constants + scratch
            + O * 4)
    vmem_limit = int(min(max(4 * need, 8 << 20), _vmem_budget_bytes()))

    # >= 2 steps on 'parallel' axes at realistic shapes -> both v7x TensorCores are used
    grid = (N, T // tT)

    out_flat = pl.pallas_call(
        _fused_msgcn_kernel,
        out_shape=jax.ShapeDtypeStruct((N, O, T * Vp), cd),
        grid_spec=pltpu.PrefetchScalarGridSpec(
            num_scalar_prefetch=0,
            grid=grid,
            in_specs=[
                pl.BlockSpec((1, C, tTV), lambda n, t: (n, 0, t)),
                # constant index maps below: DMA'd into VMEM only once for the whole grid
                pl.BlockSpec((tTV, S * tTV), lambda n, t: (0, 0)),
                pl.BlockSpec((O, S * C), lambda n, t: (0, 0)),
                pl.BlockSpec((O, 1), lambda n, t: (0, 0)),
            ],
            out_specs=pl.BlockSpec((1, O, tTV), lambda n, t: (n, 0, t)),
            scratch_shapes=[pltpu.VMEM((S * C, tTV), cd)],
        ),
        compiler_params=pltpu.CompilerParams(
            dimension_semantics=("parallel", "parallel"),
            vmem_limit_bytes=vmem_limit,
        ),
    )(x_flat, consts["M_cat"], consts["w_f"], consts["shift"])

    out = out_flat.reshape(N, O, T, Vp)                         # already NCHW order
    return out if Vp == V else out[:, :, :, :V]


# ----------------------------- pure-JAX reference ----------------------------------------
def reference_forward(x, params, num_scales):
    N, C, T, V = x.shape
    S = num_scales
    A = params["A_powers"] + params["A_res"]
    support = jnp.einsum("vu,nctu->nctv", A, x)
    support = support.reshape(N, C, T, S, V).transpose(0, 3, 1, 2, 4).reshape(N, S * C, T, V)
    out = jnp.einsum("oc,nctv->notv", params["conv_w"], support) + params["conv_b"][None, :, None, None]
    inv = 1.0 / jnp.sqrt(params["bn_var"] + params["bn_eps"])
    out = (out - params["bn_mean"][None, :, None, None]) * (params["bn_gamma"] * inv)[None, :, None, None] \
          + params["bn_beta"][None, :, None, None]
    return jnp.maximum(out, 0.0)


# ----------------------------- main -------------------------------------------------------
if __name__ == "__main__":
    N, C_in, T, V = 2, 4, 16, 16
    num_scales = 4
    out_channels = 32

    # deterministic skeleton graph: a path with two extra branches
    A_binary = np.zeros((V, V), dtype=np.float64)
    for i in range(V - 1):
        A_binary[i, i + 1] = 1.0
        A_binary[i + 1, i] = 1.0
    A_binary[0, 5] = A_binary[5, 0] = 1.0
    A_binary[3, 10] = A_binary[10, 3] = 1.0

    A_powers_np = build_A_powers(A_binary, num_scales)          # (S*V, V)

    key = jax.random.PRNGKey(0)
    k1, k2, k3, k4, k5, k6, k7, k8 = jax.random.split(key, 8)

    params = {
        "A_powers": jnp.asarray(A_powers_np, jnp.float32),
        "A_res": jax.random.uniform(k1, (num_scales * V, V), jnp.float32, -1e-6, 1e-6),
        "conv_w": jax.random.normal(k2, (out_channels, num_scales * C_in), jnp.float32)
                  * (1.0 / np.sqrt(num_scales * C_in)),
        "conv_b": 0.1 * jax.random.normal(k3, (out_channels,), jnp.float32),
        "bn_gamma": 1.0 + 0.1 * jax.random.normal(k4, (out_channels,), jnp.float32),
        "bn_beta": 0.1 * jax.random.normal(k5, (out_channels,), jnp.float32),
        "bn_mean": 0.1 * jax.random.normal(k6, (out_channels,), jnp.float32),
        "bn_var": 1.0 + jnp.abs(0.1 * jax.random.normal(k7, (out_channels,), jnp.float32)),
        "bn_eps": jnp.float32(1e-5),
    }
    # TODO(synk): dropout=0 (identity) and BatchNorm uses running stats (eval mode);
    # training-mode batch statistics are not reproduced.

    x = jax.random.normal(k8, (N, C_in, T, V), jnp.float32)

    # constants prepared ONCE (not per call) -- review item 3
    consts_f32 = prepare_msgcn(params, num_scales, T, V, compute_dtype=jnp.float32)
    consts_bf16 = prepare_msgcn(params, num_scales, T, V, compute_dtype=jnp.bfloat16)

    # strict-precision f32 path
    fwd = jax.jit(lambda xx: multiscale_graph_conv_forward(xx, consts_f32))
    out = fwd(x)
    jax.block_until_ready(out)

    ref = reference_forward(x, params, num_scales)
    assert out.shape == (N, out_channels, T, V), out.shape
    assert jnp.allclose(out, ref, rtol=1e-4, atol=1e-4), \
        float(jnp.max(jnp.abs(out - ref)))

    # default inference path: bf16 inputs/constants, f32 MXU accumulation + f32 epilogue
    fwd_bf16 = jax.jit(lambda xx: multiscale_graph_conv_forward(xx, consts_bf16))
    out_bf16 = fwd_bf16(x)
    jax.block_until_ready(out_bf16)
    assert jnp.allclose(out_bf16.astype(jnp.float32), ref, rtol=5e-2, atol=1e-1), \
        float(jnp.max(jnp.abs(out_bf16.astype(jnp.float32) - ref)))

    print("KERNEL_OK")
</pallas_src>

<mosaic_0001>
module attributes {stable_mosaic.version = 11 : i64} {
  func.func @_fused_msgcn_kernel(%arg0: i32, %arg1: i32, %arg2: memref<1x4x128xf32, #tpu.memory_space<vmem>>, %arg3: memref<128x512xf32, #tpu.memory_space<vmem>>, %arg4: memref<32x16xf32, #tpu.memory_space<vmem>>, %arg5: memref<32x1xf32, #tpu.memory_space<vmem>>, %arg6: memref<1x32x128xf32, #tpu.memory_space<vmem>>, %arg7: memref<16x128xf32, #tpu.memory_space<vmem>>) attributes {dimension_semantics = [#tpu.dimension_semantics<parallel>, #tpu.dimension_semantics<parallel>], iteration_bounds = array<i64: 2, 2>, scalar_prefetch = 0 : i64, scratch_operands = 1 : i64, tpu.core_type = #tpu.core_type<tc>, window_params = [{transform_indices = @transform_0, window_bounds = array<i64: 1, 4, 128>}, {pipeline_mode = #tpu.pipeline_mode<synchronous>, transform_indices = @transform_1, window_bounds = array<i64: 128, 512>}, {pipeline_mode = #tpu.pipeline_mode<synchronous>, transform_indices = @transform_2, window_bounds = array<i64: 32, 16>}, {pipeline_mode = #tpu.pipeline_mode<synchronous>, transform_indices = @transform_3, window_bounds = array<i64: 32, 1>}, {transform_indices = @transform_4, window_bounds = array<i64: 1, 32, 128>}]} {
    %c0 = arith.constant 0 : index
    %c0_0 = arith.constant 0 : index
    %c0_1 = arith.constant 0 : index
    %0 = vector.load %arg2[%c0, %c0_0, %c0_1] : memref<1x4x128xf32, #tpu.memory_space<vmem>>, vector<1x4x128xf32>
    %1 = vector.shape_cast %0 : vector<1x4x128xf32> to vector<4x128xf32>
    %c0_2 = arith.constant 0 : index
    %c0_3 = arith.constant 0 : index
    %2 = vector.load %arg3[%c0_2, %c0_3] : memref<128x512xf32, #tpu.memory_space<vmem>>, vector<128x512xf32>
    %cst = arith.constant dense<0.000000e+00> : vector<4x512xf32>
    %3 = tpu.matmul %1, %2, %cst {dimension_numbers = #tpu.dot_dimension_numbers<[1], [0], [0], [1], [0, 0, 1, 1], [], []>} : vector<4x128xf32>, vector<128x512xf32>, vector<4x512xf32> -> vector<4x512xf32>
    %4 = vector.extract_strided_slice %3 {offsets = [0, 0], sizes = [4, 128], strides = [1, 1]} : vector<4x512xf32> to vector<4x128xf32>
    %c0_4 = arith.constant 0 : index
    %c0_5 = arith.constant 0 : index
    %5 = vector.load %arg7[%c0_4, %c0_5] : memref<16x128xf32, #tpu.memory_space<vmem>>, vector<4x128xf32>
    tpu.vector_store %arg7[%c0_4, %c0_5], %4 {strides = array<i32>} : memref<16x128xf32, #tpu.memory_space<vmem>>, vector<4x128xf32>,
    %6 = vector.extract_strided_slice %3 {offsets = [0, 128], sizes = [4, 128], strides = [1, 1]} : vector<4x512xf32> to vector<4x128xf32>
    %c4 = arith.constant 4 : index
    %c0_6 = arith.constant 0 : index
    %7 = vector.load %arg7[%c4, %c0_6] : memref<16x128xf32, #tpu.memory_space<vmem>>, vector<4x128xf32>
    tpu.vector_store %arg7[%c4, %c0_6], %6 {strides = array<i32>} : memref<16x128xf32, #tpu.memory_space<vmem>>, vector<4x128xf32>,
    %8 = vector.extract_strided_slice %3 {offsets = [0, 256], sizes = [4, 128], strides = [1, 1]} : vector<4x512xf32> to vector<4x128xf32>
    %c8 = arith.constant 8 : index
    %c0_7 = arith.constant 0 : index
    %9 = vector.load %arg7[%c8, %c0_7] : memref<16x128xf32, #tpu.memory_space<vmem>>, vector<4x128xf32>
    tpu.vector_store %arg7[%c8, %c0_7], %8 {strides = array<i32>} : memref<16x128xf32, #tpu.memory_space<vmem>>, vector<4x128xf32>,
    %10 = vector.extract_strided_slice %3 {offsets = [0, 384], sizes = [4, 128], strides = [1, 1]} : vector<4x512xf32> to vector<4x128xf32>
    %c12 = arith.constant 12 : index
    %c0_8 = arith.constant 0 : index
    %11 = vector.load %arg7[%c12, %c0_8] : memref<16x128xf32, #tpu.memory_space<vmem>>, vector<4x128xf32>
    tpu.vector_store %arg7[%c12, %c0_8], %10 {strides = array<i32>} : memref<16x128xf32, #tpu.memory_space<vmem>>, vector<4x128xf32>,
    %c0_9 = arith.constant 0 : index
    %c0_10 = arith.constant 0 : index
    %12 = vector.load %arg4[%c0_9, %c0_10] : memref<32x16xf32, #tpu.memory_space<vmem>>, vector<32x16xf32>
    %c0_11 = arith.constant 0 : index
    %c0_12 = arith.constant 0 : index
    %13 = vector.load %arg7[%c0_11, %c0_12] : memref<16x128xf32, #tpu.memory_space<vmem>>, vector<16x128xf32>
    %cst_13 = arith.constant dense<0.000000e+00> : vector<32x128xf32>
    %14 = tpu.matmul %12, %13, %cst_13 {dimension_numbers = #tpu.dot_dimension_numbers<[1], [0], [0], [1], [0, 0, 1, 1], [], []>} : vector<32x16xf32>, vector<16x128xf32>, vector<32x128xf32> -> vector<32x128xf32>
    %c0_14 = arith.constant 0 : index
    %c0_15 = arith.constant 0 : index
    %15 = vector.load %arg5[%c0_14, %c0_15] : memref<32x1xf32, #tpu.memory_space<vmem>>, vector<32x1xf32>
    %16 = vector.broadcast %15 : vector<32x1xf32> to vector<32x128xf32>
    %17 = arith.addf %14, %16 : vector<32x128xf32>
    %cst_16 = arith.constant 0.000000e+00 : f32
    %18 = vector.broadcast %cst_16 : f32 to vector<32x128xf32>
    %19 = arith.maximumf %17, %18 : vector<32x128xf32>
    %c0_17 = arith.constant 0 : index
    %c0_18 = arith.constant 0 : index
    %c0_19 = arith.constant 0 : index
    %20 = vector.load %arg6[%c0_17, %c0_18, %c0_19] : memref<1x32x128xf32, #tpu.memory_space<vmem>>, vector<1x32x128xf32>
    %21 = vector.shape_cast %20 : vector<1x32x128xf32> to vector<32x128xf32>
    %22 = vector.shape_cast %19 : vector<32x128xf32> to vector<1x32x128xf32>
    tpu.vector_store %arg6[%c0_17, %c0_18, %c0_19], %22 {strides = array<i32>} : memref<1x32x128xf32, #tpu.memory_space<vmem>>, vector<1x32x128xf32>,
    return
  }
  func.func @transform_0(%arg0: i32, %arg1: i32) -> (i32, i32, i32) {
    %c0_i32 = arith.constant 0 : i32
    %c0_i32_0 = arith.constant 0 : i32
    return %arg0, %c0_i32, %arg1 : i32, i32, i32
  }
  func.func @transform_1(%arg0: i32, %arg1: i32) -> (i32, i32) {
    %c0_i32 = arith.constant 0 : i32
    %c0_i32_0 = arith.constant 0 : i32
    %c0_i32_1 = arith.constant 0 : i32
    return %c0_i32, %c0_i32_0 : i32, i32
  }
  func.func @transform_2(%arg0: i32, %arg1: i32) -> (i32, i32) {
    %c0_i32 = arith.constant 0 : i32
    %c0_i32_0 = arith.constant 0 : i32
    %c0_i32_1 = arith.constant 0 : i32
    return %c0_i32, %c0_i32_0 : i32, i32
  }
  func.func @transform_3(%arg0: i32, %arg1: i32) -> (i32, i32) {
    %c0_i32 = arith.constant 0 : i32
    %c0_i32_0 = arith.constant 0 : i32
    %c0_i32_1 = arith.constant 0 : i32
    return %c0_i32, %c0_i32_0 : i32, i32
  }
  func.func @transform_4(%arg0: i32, %arg1: i32) -> (i32, i32, i32) {
    %c0_i32 = arith.constant 0 : i32
    %c0_i32_0 = arith.constant 0 : i32
    return %arg0, %c0_i32, %arg1 : i32, i32, i32
  }
}

</mosaic_0001>

<bundles_post_ra>
// kernel: _lambda_.1
= control target key start
LH: loop header
LB: loop body
LE: loop exit
PB: predicated region body
PF: predicated region fallthrough
CT: control target
= control target key end

     0   :  { %9 = vsyncpa [#allocation4], 0  ;;  %s1012_s15 = smov 0   ;;  %s1014_s16 = smov 0   ;;  %s1180_s0 = inlined_call_operand.vmem [shape: f32[2,4,256], index: 0, kind: input, shape index: {}]   ;;  %s1181_s1 = inlined_call_operand.hbm [shape: f32[128,512], index: 1, kind: input, shape index: {}]   ;;  %s1182_s2 = inlined_call_operand.vmem [shape: f32[32,16], index: 2, kind: input, shape index: {}]   ;;  %s1183_s3 = inlined_call_operand.vmem [shape: f32[32,1], index: 3, kind: input, shape index: {}]   ;;  %s1184_s4 = inlined_call_operand.vmem [shape: f32[2,32,256], index: 4, kind: output, shape index: {}]  }
   0x1   :  { %s1016_s17 = smov 0   ;;  %s1018_s18 = smov 0  }
   0x2   :  { %s1020_s19 = smov 0   ;;  %s1022_s20 = smov 0  }
   0x3   :  { %s1024_s21 = smov 0  }
   0x4 LB: > { %s716_s22 = sadd.s32 4294967295, %s980_s21   ;;  %s24_s23 = sadd.s32 1, %s972_s19  ;;  %s980_s21 = sphi %s1024_s21, %s15_s21   ;;  %s976_s20 = sphi %s1022_s20, %s1200_s20   ;;  %s972_s19 = sphi %s1020_s19, %s1199_s19   ;;  %s968_s18 = sphi %s1018_s18, %s1198_s18   ;;  %s964_s17 = sphi %s1016_s17, %s1197_s17   ;;  %s960_s16 = sphi %s1014_s16, %s1196_s16   ;;  %s956_s15 = sphi %s1012_s15, %s1195_s15  }
   0x5   : > { %p25_p0 = scmp.ge.s32.totalorder %s24_s23, 2  ;;  %s27_s24 = sadd.s32 1, %s976_s20 }
   0x6   : > { %s127_s25 = sadd.s32 1, %s960_s16  ;;  %p137_p1 = scmp.ne.s32.totalorder %s960_s16, %s956_s15 }
   0x7   : > { %s1202_s23 = smov (%p25_p0, %s24_s23), 0  ;;  %s1204_s24 = smov (!%p25_p0, %s27_s24), %s976_s20 }
   0x8   : > { %s123_s26 = ssub.s32 %s972_s19, %s1202_s23  ;;  %p138_p2 = scmp.eq.s32.totalorder %s716_s22, 3 }
   0x9   : > { %p29_p3 = scmp.ge.s32.totalorder %s1204_s24, 2  ;;  %p718_p4 = scmp.ge.s32.totalorder %s980_s21, 1 }
   0xa   : > { %p1059_p5 = por %p138_p2, %p137_p1  ;;  %p151_p6 = scmp.lt.s32.totalorder %s980_s21, 5 }
   0xb   : > { %s1206_s24 = smov (%p29_p3, %s1204_s24), 0  ;;  %p1072_p8 = scmp.eq.s32.totalorder %s716_s22, 0 }
   0xc   : > { %s1188_s27 = scalar_select %p1059_p5, 1, 0 }
   0xd   : > { %p1066_p7 = pnand %p718_p4, %p151_p6  ;;  %s122_s29 = ssub.s32 %s976_s20, %s1206_s24 }
   0xe   : > { %s1190_s30 = scalar_select %p1072_p8, 1, 0 }
   0xf   : > { %s1189_s28 = scalar_select %p1066_p7, 1, 0 }
  0x10   : > { %s124_s5 = sor.u32 %s123_s26, %s122_s29  ;;  %p825_p9 = pneg %p1066_p7 }
  0x11   : > { %p125_p10 = scmp.eq.s32.totalorder %s124_s5, 0  ;;  %s982_s6 = smov [#allocation3]  }
  0x12   : > { %s163_s7 = sshll.u32 %s982_s6, 4  ;;  %p1080_p11 = pnand %p1072_p8, %p825_p9  ;;  %s164_s7 = int_to_ptr.vmem [resolvable:$true] %s163_s7 }
  0x13   : > { %s1085_s9 = scalar_select %p125_p10, %s960_s16, %s127_s25  }
  0x14   : > { %s894_s12 = scalar_lea.hbm %s1181_s1, 8192  ;;  %p896_p13 = pneg %p1080_p11 }
  0x15   : > { %p895_p12 = scmp.ne.s32.totalorder %s1181_s1, %s894_s12  ;;  %p901_p2 = scmp.lt.u32.totalorder %s894_s12, %s1181_s1 }
  0x17   : > { %p897_p0 = pnand %p896_p13, %p895_p12 }
  0x19   : > { %p898_p1 = pneg %p897_p0 }
  0x1b   : > { %p903_p3 = pnand %p901_p2, %p898_p1 }
  0x1d   : > { %906 = shalt.err (!%p903_p3)
}
  0x1e   : > { %s907_s25 = scalar_lea.vmem %s164_s7, 8192  ;;  %p915_p10 = scmp.lt.s32.totalorder %s164_s7, %s164_s7 }
  0x1f   : > { %p908_p4 = scmp.ne.s32.totalorder %s164_s7, %s907_s25  ;;  %p916_p5 = scmp.lt.s32.totalorder %s907_s25, %s907_s25 }
  0x21   : > { %p910_p6 = pnand %p908_p4, %p896_p13  ;;  %p917_p8 = por %p916_p5, %p915_p10 }
  0x23   : > { %p911_p9 = pneg %p910_p6 }
  0x25   : > { %p918_p7 = pnand %p917_p8, %p911_p9 }
  0x27   : > { %921 = shalt.err (!%p918_p7)
}
  0x28   : > { %s983_s29 = smov 512   ;;  %s984_s5 = smov 32  }
  0x29   : > { %828 = dma.hbm_to_vmem [thread:$0]  (!%p1080_p11), %s1181_s1, 8192, %s164_s7, [#allocation4], %s983_s29, %s983_s29, %s984_s5  }
  0x2a   : > { %p1192_p12 = scmp.ne.s32.totalorder %s1189_s28, 0 }
  0x2b   : > { %p1193_p0 = scmp.ne.s32.totalorder (!%p1192_p12), %s1190_s30, 0 }
  0x2c   : > { %196 = sbr.rel (%p1192_p12) target bundleno = 542 (0x21e), region = 36 }
  0x33   : > { %951 = dma.done.wait (%p1193_p0), [#allocation4], 8192  }
  0x34   : > { %953 = vsyncadd (%p1193_p0), [#allocation4], 4294959104  ;;  %v985_v0 = vmov 0.0   ;;  %v234_v1 = vld [vmem:[#allocation3 + $0x8] sm:$0xff]  ;;  %v236_v3 = vld [vmem:[#allocation3 + $0x18] sm:$0xff]  ;;  %p224_p5 = scmp.lt.s32.totalorder %s968_s18, 1 }
  0x35   : > { %361 = vmatprep.mubr.f32.mxu0 %v985_v0  ;;  %432 = vmatprep.mubr.f32.mxu1 %v985_v0  ;;  %v238_v2 = vld [vmem:[#allocation3 + $0x28] sm:$0xff]  ;;  %v240_v5 = vld [vmem:[#allocation3 + $0x38] sm:$0xff]  ;;  %v233_v6 = vld [vmem:[#allocation3] sm:$0xff]  ;;  %p226_p7 = scmp.lt.s32.totalorder %s964_s17, 1  ;;  %vm473_vm0 = vcmask 130048   ;;  %s221_s26 = sand.u32 1, %s956_s15  }
  0x36   : > { %v751_v4 = vpack.c.bf16 %v238_v2, %v234_v1  ;;  %v237_v7 = vld [vmem:[#allocation3 + $0x20] sm:$0xff]  ;;  %v783_v8 = vpack.c.bf16 %v240_v5, %v236_v3  ;;  %v235_v10 = vld [vmem:[#allocation3 + $0x10] sm:$0xff]  ;;  %v242_v12 = vld [vmem:[#allocation3 + $0x48] sm:$0xff]  ;;  %s1114_s28 = scalar_select %p224_p5, %s968_s18, 1 }
  0x37   : > { %v753_v9 = vpack.c.bf16 %v237_v7, %v233_v6  ;;  %v239_v11 = vld [vmem:[#allocation3 + $0x30] sm:$0xff]  ;;  %v246_v14 = vld [vmem:[#allocation3 + $0x68] sm:$0xff]  ;;  %v244_v15 = vld [vmem:[#allocation3 + $0x58] sm:$0xff]  ;;  %s227_s30 = scalar_select %p226_p7, %s964_s17, 1 }
  0x38   : > { %752 = vmatprep.subr.bf16.mxu0 %v751_v4  ;;  %v785_v13 = vpack.c.bf16 %v239_v11, %v235_v10  ;;  %v248_v16 = vld [vmem:[#allocation3 + $0x78] sm:$0xff]  ;;  %784 = vmatprep.subr.bf16.mxu1 %v783_v8  ;;  %v755_v17 = vpack.c.bf16 %v246_v14, %v242_v12  ;;  %v241_v19 = vld [vmem:[#allocation3 + $0x40] sm:$0xff]  ;;  %v243_v21 = vld [vmem:[#allocation3 + $0x50] sm:$0xff]  ;;  %s724_s7 = sshll.u32 %s1114_s28, 1  ;;  %s723_s25 = sshll.u32 %s221_s26, 5 }
  0x39   : > { %754 = vmatpush1.bf16.msra.mxu0 %v753_v9  ;;  %v787_v18 = vpack.c.bf16 %v248_v16, %v244_v15  ;;  %v245_v20 = vld [vmem:[#allocation3 + $0x60] sm:$0xff]  ;;  %v247_v23 = vld [vmem:[#allocation3 + $0x70] sm:$0xff]  ;;  %v250_v24 = vld [vmem:[#allocation3 + $0x88] sm:$0xff]  ;;  %s229_s8 = sadd.s32 %s724_s7, %s227_s30  ;;  %s223_s29 = scalar_lea.vmem [#allocation5], %s723_s25 }
  0x3a   : > { %786 = vmatpush1.bf16.msra.mxu1 %v785_v13  ;;  %v757_v22 = vpack.c.bf16 %v245_v20, %v241_v19  ;;  %v254_v25 = vld [vmem:[#allocation3 + $0xa8] sm:$0xff]  ;;  %756 = vmatprep.subr.bf16.mxu0 %v755_v17  ;;  %v789_v26 = vpack.c.bf16 %v247_v23, %v243_v21  ;;  %v252_v28 = vld [vmem:[#allocation3 + $0x98] sm:$0xff]  ;;  %v249_v30 = vld [vmem:[#allocation3 + $0x80] sm:$0xff]  ;;  %s725_s11 = sshll.u32 %s229_s8, 2  ;;  %p1194_p8 = scmp.ne.s32.totalorder %s1188_s27, 0 }
  0x3b   : > { %788 = vmatprep.subr.bf16.mxu1 %v787_v18  ;;  %v759_v27 = vpack.c.bf16 %v254_v25, %v250_v24  ;;  %v256_v29 = vld [vmem:[#allocation3 + $0xb8] sm:$0xff]  ;;  %v253_v32 = vld [vmem:[#allocation3 + $0xa0] sm:$0xff]  ;;  %v251_v33 = vld [vmem:[#allocation3 + $0x90] sm:$0xff]  ;;  %s231_s14 = scalar_lea.vmem %s1180_s0, %s725_s11  ;;  %s731_s15 = sshll.u32 (%p1194_p8), %s968_s18, 3 }
  0x3c   : > { %v791_v31 = vpack.c.bf16 %v256_v29, %v252_v28  ;;  %v255_v34 = vld [vmem:[#allocation3 + $0xb0] sm:$0xff]  ;;  %v761_v35 = vpack.c.bf16 %v253_v32, %v249_v30  ;;  %v258_v36 = vld [vmem:[#allocation3 + $0xc8] sm:$0xff]  ;;  %v260_v38 = vld [vmem:[#allocation3 + $0xd8] sm:$0xff]  ;;  %s587_s5 = sadd.s32 (%p1194_p8), %s964_s17, %s731_s15 }
  0x3d   : > { %758 = vmatpush1.bf16.msra.mxu0 %v757_v22  ;;  %v262_v37 = vld [vmem:[#allocation3 + $0xe8] sm:$0xff]  ;;  %v793_v39 = vpack.c.bf16 %v255_v34, %v251_v33  ;;  %v264_v41 = vld [vmem:[#allocation3 + $0xf8] sm:$0xff]  ;;  %v257_v42 = vld [vmem:[#allocation3 + $0xc0] sm:$0xff]  ;;  %s732_s6 = sshll.u32 (%p1194_p8), %s587_s5, 3 }
  0x3e   : > { %790 = vmatpush1.bf16.msra.mxu1 %v789_v26  ;;  %760 = vmatprep.subr.bf16.mxu0 %v759_v27  ;;  %v763_v40 = vpack.c.bf16 %v262_v37, %v258_v36  ;;  %v261_v43 = vld [vmem:[#allocation3 + $0xe0] sm:$0xff]  ;;  %v795_v44 = vpack.c.bf16 %v264_v41, %v260_v38  ;;  %v259_v45 = vld [vmem:[#allocation3 + $0xd0] sm:$0xff]  ;;  %v266_v47 = vld [vmem:[#allocation3 + $0x108] sm:$0xff]  ;;  %v986_v38 = vmov 0   ;;  %s589_s30 = scalar_lea.vmem (%p1194_p8), %s1184_s4, %s732_s6 }
  0x3f   : > { %792 = vmatprep.subr.bf16.mxu1 %v791_v31  ;;  %v263_v46 = vld [vmem:[#allocation3 + $0xf0] sm:$0xff]  ;;  %v270_v48 = vld [vmem:[#allocation3 + $0x128] sm:$0xff]  ;;  %v268_v49 = vld [vmem:[#allocation3 + $0x118] sm:$0xff]  ;;  %v765_v51 = vpack.c.bf16 %v261_v43, %v257_v42  ;;  %893 = vset.pattern.permute.xlu1 %v986_v38 }
  0x40   : > { %v272_v50 = vld [vmem:[#allocation3 + $0x138] sm:$0xff]  ;;  %v797_v52 = vpack.c.bf16 %v263_v46, %v259_v45  ;;  %v767_v53 = vpack.c.bf16 %v270_v48, %v266_v47  ;;  %v265_v54 = vld [vmem:[#allocation3 + $0x100] sm:$0xff]  ;;  %v267_v56 = vld [vmem:[#allocation3 + $0x110] sm:$0xff]  ;;  %892 = vset.pattern.permute.xlu0 %v986_v38 }
  0x41   : > { %762 = vmatpush1.bf16.msra.mxu0 %v761_v35  ;;  %v269_v55 = vld [vmem:[#allocation3 + $0x120] sm:$0xff]  ;;  %v799_v57 = vpack.c.bf16 %v272_v50, %v268_v49  ;;  %v271_v58 = vld [vmem:[#allocation3 + $0x130] sm:$0xff]  ;;  %v274_v59 = vld [vmem:[#allocation3 + $0x148] sm:$0xff] }
  0x42   : > { %794 = vmatpush1.bf16.msra.mxu1 %v793_v39  ;;  %764 = vmatprep.subr.bf16.mxu0 %v763_v40  ;;  %v278_v60 = vld [vmem:[#allocation3 + $0x168] sm:$0xff]  ;;  %v276_v61 = vld [vmem:[#allocation3 + $0x158] sm:$0xff]  ;;  %v769_v63 = vpack.c.bf16 %v269_v55, %v265_v54  ;;  %v801_v0 = vpack.c.bf16 %v271_v58, %v267_v56  ;;  %v273_v2 = vld [vmem:[#allocation3 + $0x140] sm:$0xff] }
  0x43   : > { %796 = vmatprep.subr.bf16.mxu1 %v795_v44  ;;  %v280_v62 = vld [vmem:[#allocation3 + $0x178] sm:$0xff]  ;;  %v771_v1 = vpack.c.bf16 %v278_v60, %v274_v59  ;;  %v277_v3 = vld [vmem:[#allocation3 + $0x160] sm:$0xff]  ;;  %v275_v4 = vld [vmem:[#allocation3 + $0x150] sm:$0xff] }
  0x44   : > { %v803_v5 = vpack.c.bf16 %v280_v62, %v276_v61  ;;  %v279_v6 = vld [vmem:[#allocation3 + $0x170] sm:$0xff]  ;;  %v282_v7 = vld [vmem:[#allocation3 + $0x188] sm:$0xff]  ;;  %v284_v9 = vld [vmem:[#allocation3 + $0x198] sm:$0xff]  ;;  %v773_v11 = vpack.c.bf16 %v277_v3, %v273_v2 }
  0x45   : > { %766 = vmatpush1.bf16.msra.mxu0 %v765_v51  ;;  %v286_v8 = vld [vmem:[#allocation3 + $0x1a8] sm:$0xff]  ;;  %v288_v10 = vld [vmem:[#allocation3 + $0x1b8] sm:$0xff]  ;;  %v805_v12 = vpack.c.bf16 %v279_v6, %v275_v4  ;;  %v281_v14 = vld [vmem:[#allocation3 + $0x180] sm:$0xff] }
  0x46   : > { %798 = vmatpush1.bf16.msra.mxu1 %v797_v52  ;;  %768 = vmatprep.subr.bf16.mxu0 %v767_v53  ;;  %v775_v13 = vpack.c.bf16 %v286_v8, %v282_v7  ;;  %v285_v15 = vld [vmem:[#allocation3 + $0x1a0] sm:$0xff]  ;;  %v283_v16 = vld [vmem:[#allocation3 + $0x190] sm:$0xff]  ;;  %v807_v17 = vpack.c.bf16 %v288_v10, %v284_v9  ;;  %v290_v19 = vld [vmem:[#allocation3 + $0x1c8] sm:$0xff] }
  0x47   : > { %800 = vmatprep.subr.bf16.mxu1 %v799_v57  ;;  %v287_v18 = vld [vmem:[#allocation3 + $0x1b0] sm:$0xff]  ;;  %v294_v20 = vld [vmem:[#allocation3 + $0x1e8] sm:$0xff]  ;;  %v292_v21 = vld [vmem:[#allocation3 + $0x1d8] sm:$0xff]  ;;  %v777_v23 = vpack.c.bf16 %v285_v15, %v281_v14 }
  0x48   : > { %v296_v22 = vld [vmem:[#allocation3 + $0x1f8] sm:$0xff]  ;;  %v809_v24 = vpack.c.bf16 %v287_v18, %v283_v16  ;;  %v779_v25 = vpack.c.bf16 %v294_v20, %v290_v19  ;;  %v289_v26 = vld [vmem:[#allocation3 + $0x1c0] sm:$0xff]  ;;  %v291_v29 = vld [vmem:[#allocation3 + $0x1d0] sm:$0xff] }
  0x49   : > { %770 = vmatpush1.bf16.msra.mxu0 %v769_v63  ;;  %v293_v27 = vld [vmem:[#allocation3 + $0x1e0] sm:$0xff]  ;;  %v811_v28 = vpack.c.bf16 %v296_v22, %v292_v21  ;;  %v295_v30 = vld [vmem:[#allocation3 + $0x1f0] sm:$0xff]  ;;  %v452_v39 = vld [vmem:[%s1183_s3 + $0x18] sm:$0xff] }
  0x4a   : > { %802 = vmatpush1.bf16.msra.mxu1 %v801_v0  ;;  %772 = vmatprep.subr.bf16.mxu0 %v771_v1  ;;  %v781_v31 = vpack.c.bf16 %v293_v27, %v289_v26  ;;  %v813_v32 = vpack.c.bf16 %v295_v30, %v291_v29  ;;  %v232_v33 = vld [vmem:[%s231_s14] sm:$0xf]  ;;  %v445_v35 = vld [vmem:[%s1182_s2 + $0x10] sm:$0xff]  ;;  %v450_v40 = vld [vmem:[%s1183_s3 + $0x8] sm:$0xff] }
  0x4b   : > { %804 = vmatprep.subr.bf16.mxu1 %v803_v5  ;;  %v443_v34 = vld [vmem:[%s1182_s2] sm:$0xff]  ;;  %v451_v36 = vld [vmem:[%s1183_s3 + $0x10] sm:$0xff]  ;;  %v444_v48 = vld [vmem:[%s1182_s2 + $0x8] sm:$0xff] }
  0x4c   : > { %v449_v37 = vld [vmem:[%s1183_s3] sm:$0xff]  ;;  %465 = vperm.xlu1 %893, %v451_v36   ;;  %v446_v49 = vld [vmem:[%s1182_s2 + $0x18] sm:$0xff] }
  0x4d   : > { %774 = vmatpush1.bf16.msra.mxu0 %v773_v11  ;;  %455 = vperm.xlu0 %892, %v449_v37  }
  0x4e   : > { %806 = vmatpush1.bf16.msra.mxu1 %v805_v12  ;;  %776 = vmatprep.subr.bf16.mxu0 %v775_v13 }
  0x4f   : > { %808 = vmatprep.subr.bf16.mxu1 %v807_v17 }
  0x50   : > { %470 = vperm.xlu1 %893, %v452_v39  }
  0x51   : > { %778 = vmatpush1.bf16.msra.mxu0 %v777_v23  ;;  %460 = vperm.xlu0 %892, %v450_v40  }
  0x52   : > { %810 = vmatpush1.bf16.msra.mxu1 %v809_v24  ;;  %780 = vmatprep.subr.bf16.mxu0 %v779_v25 }
  0x53   : > { %812 = vmatprep.subr.bf16.mxu1 %v811_v28 }
  0x55   : > { %782 = vmatpush1.bf16.msra.mxu0 %v781_v31 }
  0x56   : > { %814 = vmatpush1.bf16.msra.mxu1 %v813_v32 }
  0x58   : > { %362 = vmatmul.mubr.f32.vlgmr.msra.gmra.mrb[0].mxu0 %v232_v33 }
  0x59   : > { %433 = vmatmul.mubr.f32.vlgmr.msra.gmra.mrb[0].mxu1 %v232_v33  ;;  %745 = vmatprep.mubr.msk.f32.mxu0 %vm473_vm0, %v443_v34 }
  0x5a   : > { %748 = vmatprep.mubr.msk.f32.mxu1 %vm473_vm0, %v445_v35 }
  0xcb   : > { %v466_v50 = vpop.permute.xlu1 %465 }
  0xcc   : > { %v456_v51 = vpop.permute.xlu0 %455 }
  0xcf   : > { %v471_v52 = vpop.permute.xlu1 %470 }
  0xd0   : > { %v461_v53 = vpop.permute.xlu0 %460 }
 0x12b   : > { %v363_v41 = vpop.f32.mrb[0].mxu0 }
 0x12c   : > { %439 = vst [vmem:[#allocation2] sm:$0xf] %v363_v41  ;;  %v434_v42 = vpop.f32.mrb[0].mxu1  ;;  %v365_v43 = vpop.f32.mrb[1].mxu0 }
 0x12d   : > { %441 = vst [vmem:[#allocation2 + $0x8] sm:$0xf] %v434_v42  ;;  %440 = vst [vmem:[#allocation2 + $0x4] sm:$0xf] %v365_v43  ;;  %v436_v44 = vpop.f32.mrb[1].mxu1 }
 0x12e   : > { %442 = vst [vmem:[#allocation2 + $0xc] sm:$0xf] %v436_v44 }
 0x134   : > { %v447_v45 = vld [vmem:[#allocation2] sm:$0xff] }
 0x135   : > { %v448_v46 = vld [vmem:[#allocation2 + $0x8] sm:$0xff] }
 0x136   : > { %v815_v47 = vpack.c.bf16 %v448_v46, %v447_v45 }
 0x138   : > { %816 = vmatprep.subr.bf16.mxu0 %v815_v47  ;;  %819 = vmatprep.subr.bf16.mxu1 %v815_v47 }
 0x139   : > { %818 = vmatpush3.bf16.msra.mxu0 %v815_v47  ;;  %820 = vmatpush3.bf16.msra.mxu1 %v815_v47 }
 0x13c   : > { %746 = vmatmul.mubr.msk.f32.vlgmr.msra.gmra.mrb[2].mxu0 %vm473_vm0, %v444_v48  ;;  %749 = vmatmul.mubr.msk.f32.vlgmr.msra.gmra.mrb[2].mxu1 %vm473_vm0, %v446_v49 }
 0x20f   : > { %v747_v54 = vpop.f32.mrb[2].mxu0  ;;  %v750_v55 = vpop.f32.mrb[2].mxu1  ;;  %585 = sbr.rel (!%p1194_p8) target bundleno = 542 (0x21e), region = 44 }
 0x210   : > { %v558_v56 = vadd.f32 %v747_v54, %v461_v53  ;;  %v568_v57 = vadd.f32 %v750_v55, %v471_v52  ;;  %v552_v58 = vpop.f32.mrb[3].mxu0  ;;  %v562_v59 = vpop.f32.mrb[3].mxu1 }
 0x211   : > { %v553_v60 = vadd.f32 %v552_v58, %v456_v51  ;;  %v563_v61 = vadd.f32 %v562_v59, %v466_v50 }
 0x212   : > { %v572_v62 = vmax.f32 %v558_v56, 0.0  ;;  %v574_v63 = vmax.f32 %v568_v57, 0.0 }
 0x213   : > { %v571_v0 = vmax.f32 %v553_v60, 0.0  ;;  %v573_v1 = vmax.f32 %v563_v61, 0.0 }
 0x214   : > { %576 = vst [vmem:[%s223_s29 + $0x8] sm:$0xff] %v572_v62  ;;  %578 = vst [vmem:[%s223_s29 + $0x18] sm:$0xff] %v574_v63 }
 0x215   : > { %575 = vst [vmem:[%s223_s29] sm:$0xff] %v571_v0  ;;  %577 = vst [vmem:[%s223_s29 + $0x10] sm:$0xff] %v573_v1 }
 0x21b   : > { %v625_v3 = vld [vmem:[%s223_s29 + $0x8] sm:$0xff]  ;;  %v629_v5 = vld [vmem:[%s223_s29 + $0x18] sm:$0xff] }
 0x21c   : > { %v623_v2 = vld [vmem:[%s223_s29] sm:$0xff]  ;;  %v627_v4 = vld [vmem:[%s223_s29 + $0x10] sm:$0xff]  ;;  %626 = vst [vmem:[%s589_s30 + $0x10] sm:$0xff] %v625_v3  ;;  %630 = vst [vmem:[%s589_s30 + $0x30] sm:$0xff] %v629_v5 }
 0x21d   : > { %624 = vst [vmem:[%s589_s30] sm:$0xff] %v623_v2  ;;  %628 = vst [vmem:[%s589_s30 + $0x20] sm:$0xff] %v627_v4 }
 0x21e PF: > { %s15_s21 = sadd.s32 1, %s980_s21   ;;  %s1195_s15 = smov %s960_s16 }
 0x21f   : > { %p12_p11 = scmp.ge.s32.totalorder %s15_s21, 6   ;;  %s1196_s16 = smov %s1085_s9 }
 0x220   : > { %s1197_s17 = smov %s972_s19  ;;  %s1198_s18 = smov %s976_s20 }
 0x221   : > { %s1199_s19 = smov %s1202_s23  ;;  %s1200_s20 = smov %s1206_s24 }
 0x222   :  { %14 = sbr.rel (!%p12_p11) target bundleno = 4 (0x4), region = 109 }
 0x229   :  { %646 = vsyncpa [#allocation4], 1 }
 0x22a   :  { %648 = vsyncpa [#allocation4 + $0x1], 1 }

</bundles_post_ra>
